<compile_context>
chip_gen: v7x
topology: tpu7x:2x2x1
jax: 0.10.0
libtpu: 0.0.40
codegen_flags: <defaults>
</compile_context>

<pallas_src>
import functools

import jax
import jax.numpy as jnp
from jax.experimental import pallas as pl
from jax.experimental.pallas import tpu as pltpu


# ----------------------------------------------------------------------------
# Kernels
# ----------------------------------------------------------------------------
def _onehot_matmul_kernel(idx_ref, table_ref, out_ref, *, n_classes):
    """Whole-table path: out = one_hot(idx) @ table   (exact row selection).

    idx_ref   : VMEM (B_pad, 1) int32 mixed class ids
    table_ref : VMEM (n_classes, embed_dim) full embedding table
    out_ref   : VMEM (B_pad, embed_dim)
    """
    idx = idx_ref[...]                                            # (B_pad, 1)
    iota = jax.lax.broadcasted_iota(jnp.int32, (idx.shape[0], n_classes), 1)
    one_hot = (iota == idx).astype(table_ref.dtype)               # exact 0/1
    out_ref[...] = jnp.dot(
        one_hot, table_ref[...], preferred_element_type=jnp.float32
    ).astype(out_ref.dtype)


def _row_gather_kernel(idx_ref, table_row_ref, out_ref):
    """Row-gather path: the data-dependent work is done by the index_map;
    the body is a straight VMEM copy of the already-DMA'd row."""
    del idx_ref  # consumed by the index_maps (scalar prefetch)
    out_ref[...] = table_row_ref[...]


# ----------------------------------------------------------------------------
# Pallas wrappers
# ----------------------------------------------------------------------------
# Rough switch point: a grid step costs ~0.35 us; at ~1.3 TB/s HBM that is
# ~450 KB of table DMA per row-gather step we could have afforded instead.
_BYTES_PER_GRID_STEP = 450_000
_WHOLE_TABLE_VMEM_BUDGET = 24 << 20   # keep the resident-table path v7x-safe (64 MiB VMEM)


def class_embedder_gather(mixed_idx, table, *, force_path=None):
    """table[mixed_idx] via Pallas.  Returns (B, embed_dim)."""
    mixed_idx = mixed_idx.astype(jnp.int32)
    (B,) = mixed_idx.shape
    n_classes, embed_dim = table.shape
    itemsize = jnp.dtype(table.dtype).itemsize

    # Pad batch to the dtype's native sublane tile (8 f32 / 16 bf16 / 32 int8)
    # so the output writeback is a dense, unmasked store.
    sublane = max(8, 32 // itemsize)
    B_pad = max(sublane, ((B + sublane - 1) // sublane) * sublane)
    if B_pad != B:
        mixed_idx = jnp.concatenate(
            [mixed_idx, jnp.zeros((B_pad - B,), jnp.int32)])

    table_bytes = n_classes * embed_dim * itemsize
    out_bytes = B_pad * embed_dim * itemsize

    use_whole_table = (
        table_bytes <= _BYTES_PER_GRID_STEP * B_pad
        and 2 * (table_bytes + out_bytes) <= _WHOLE_TABLE_VMEM_BUDGET
    )
    if force_path == "whole_table":
        use_whole_table = True
    elif force_path == "row_gather":
        use_whole_table = False

    if use_whole_table:
        # ------------------------------------------------------------------
        # Small table: one bulk DMA, one-hot x table on the MXU.
        # ------------------------------------------------------------------
        kernel = functools.partial(_onehot_matmul_kernel, n_classes=n_classes)
        # Account for default double-buffering of inputs/outputs + slack.
        vmem_limit = max(
            4 << 20,
            2 * table_bytes + 2 * out_bytes + 4 * B_pad * 4 + (2 << 20),
        )
        out = pl.pallas_call(
            kernel,
            out_shape=jax.ShapeDtypeStruct((B_pad, embed_dim), table.dtype),
            grid=(1,),
            in_specs=[
                pl.BlockSpec((B_pad, 1), lambda i: (0, 0)),               # ids
                pl.BlockSpec((n_classes, embed_dim), lambda i: (0, 0)),   # table
            ],
            out_specs=pl.BlockSpec((B_pad, embed_dim), lambda i: (0, 0)),
            compiler_params=pltpu.CompilerParams(
                dimension_semantics=("arbitrary",),
                vmem_limit_bytes=int(vmem_limit),
            ),
            cost_estimate=pl.CostEstimate(
                flops=2 * B_pad * n_classes * embed_dim,
                transcendentals=0,
                bytes_accessed=table_bytes + out_bytes + 4 * B_pad,
            ),
        )(mixed_idx[:, None], table)
        return out[:B]

    # ----------------------------------------------------------------------
    # Large table: DMA only the B_pad needed rows (scalar-prefetch gather).
    # View table as (n_classes, 1, embed_dim) so the block's trailing two dims
    # equal the array dims (no (8,128) block constraint issues).
    # ----------------------------------------------------------------------
    table3 = table.reshape(n_classes, 1, embed_dim)
    grid_spec = pltpu.PrefetchScalarGridSpec(
        num_scalar_prefetch=1,                 # mixed class ids -> SMEM
        grid=(B_pad,),
        in_specs=[
            pl.BlockSpec((1, 1, embed_dim), lambda b, idx: (idx[b], 0, 0)),
        ],
        out_specs=pl.BlockSpec((1, 1, embed_dim), lambda b, idx: (b, 0, 0)),
    )
    out = pl.pallas_call(
        _row_gather_kernel,
        out_shape=jax.ShapeDtypeStruct((B_pad, 1, embed_dim), table.dtype),
        grid_spec=grid_spec,
        compiler_params=pltpu.CompilerParams(
            dimension_semantics=("arbitrary",),
        ),
        cost_estimate=pl.CostEstimate(
            flops=0,
            transcendentals=0,
            bytes_accessed=2 * out_bytes + 4 * B_pad,
        ),
    )(mixed_idx, table3)
    return out[:B, 0, :]


def class_embedder_forward(
    class_ids: jax.Array,
    table: jax.Array,
    *,
    n_classes: int,
    ucg_rate: float = 0.1,
    disable_dropout: bool = False,
    rng: jax.Array | None = None,
    force_path: str | None = None,
) -> jax.Array:
    """Full ClassEmbedder.forward. Returns (B, 1, embed_dim)."""
    c = class_ids.astype(jnp.int32)  # (B,)
    if ucg_rate > 0.0 and not disable_dropout:
        assert rng is not None
        # TODO(synk): RNG draw stays in the JAX wrapper (torch.bernoulli eq.);
        # the drop->uncond-class mixing is folded here into one index vector.
        drop = jax.random.bernoulli(rng, p=ucg_rate, shape=c.shape)
        c = jnp.where(drop, jnp.int32(n_classes - 1), c)
    # Clamp: class ids become raw row offsets in the kernel and Pallas has no
    # runtime bounds check on VMEM/HBM refs.
    c = jnp.clip(c, 0, n_classes - 1)
    emb = class_embedder_gather(c, table, force_path=force_path)  # (B, embed_dim)
    return emb[:, None, :]                                        # (B, 1, embed_dim)


if __name__ == "__main__":
    # Small, deterministic setup (synthetic weights; no checkpoint loading).
    B = 8
    n_classes = 16
    embed_dim = 128
    ucg_rate = 0.1

    key = jax.random.PRNGKey(0)
    k_table, k_ids, k_ucg = jax.random.split(key, 3)

    # nn.Embedding default init: N(0, 1)
    table = jax.random.normal(k_table, (n_classes, embed_dim), dtype=jnp.float32)
    class_ids = jax.random.randint(k_ids, (B,), 0, n_classes, dtype=jnp.int32)

    # Pure-JAX reference with the same UCG mask realization.
    drop_ref_mask = jax.random.bernoulli(k_ucg, p=ucg_rate, shape=class_ids.shape)
    ref_idx = jnp.where(drop_ref_mask, jnp.int32(n_classes - 1), class_ids)
    ref = table[ref_idx][:, None, :]

    # Path 1: whole-table resident, one-hot MXU matmul (auto-selected here).
    out_small = class_embedder_forward(
        class_ids, table, n_classes=n_classes, ucg_rate=ucg_rate,
        disable_dropout=False, rng=k_ucg,
    )
    out_small = jax.block_until_ready(out_small)
    assert out_small.shape == (B, 1, embed_dim), out_small.shape
    assert jnp.allclose(out_small, ref), "whole-table path mismatch vs reference"

    # Path 2: scalar-prefetch row gather (the large-table path), forced here
    # at small shapes to validate it on the same inputs.
    out_gather = class_embedder_forward(
        class_ids, table, n_classes=n_classes, ucg_rate=ucg_rate,
        disable_dropout=False, rng=k_ucg, force_path="row_gather",
    )
    out_gather = jax.block_until_ready(out_gather)
    assert out_gather.shape == (B, 1, embed_dim), out_gather.shape
    assert jnp.allclose(out_gather, ref), "row-gather path mismatch vs reference"

    print("KERNEL_OK")
</pallas_src>

<mosaic_0001>
module attributes {stable_mosaic.version = 11 : i64} {
  func.func @_onehot_matmul_kernel(%arg0: i32, %arg1: memref<8x1xi32, #tpu.memory_space<vmem>>, %arg2: memref<16x128xf32, #tpu.memory_space<vmem>>, %arg3: memref<8x128xf32, #tpu.memory_space<vmem>>) attributes {dimension_semantics = [#tpu.dimension_semantics<arbitrary>], iteration_bounds = array<i64: 1>, scalar_prefetch = 0 : i64, scratch_operands = 0 : i64, tpu.core_type = #tpu.core_type<tc>, window_params = [{pipeline_mode = #tpu.pipeline_mode<synchronous>, transform_indices = @transform_0, window_bounds = array<i64: 8, 1>}, {pipeline_mode = #tpu.pipeline_mode<synchronous>, transform_indices = @transform_1, window_bounds = array<i64: 16, 128>}, {pipeline_mode = #tpu.pipeline_mode<synchronous>, transform_indices = @transform_2, window_bounds = array<i64: 8, 128>}]} {
    %c0 = arith.constant 0 : index
    %c0_0 = arith.constant 0 : index
    %0 = vector.load %arg1[%c0, %c0_0] : memref<8x1xi32, #tpu.memory_space<vmem>>, vector<8x1xi32>
    %1 = tpu.iota {dimensions = array<i32: 1>} : vector<8x16xi32>
    %2 = vector.broadcast %0 : vector<8x1xi32> to vector<8x16xi32>
    %3 = arith.cmpi eq, %1, %2 : vector<8x16xi32>
    %4 = arith.extui %3 : vector<8x16xi1> to vector<8x16xi32>
    %5 = arith.sitofp %4 : vector<8x16xi32> to vector<8x16xf32>
    %c0_1 = arith.constant 0 : index
    %c0_2 = arith.constant 0 : index
    %6 = vector.load %arg2[%c0_1, %c0_2] : memref<16x128xf32, #tpu.memory_space<vmem>>, vector<16x128xf32>
    %cst = arith.constant dense<0.000000e+00> : vector<8x128xf32>
    %7 = tpu.matmul %5, %6, %cst {dimension_numbers = #tpu.dot_dimension_numbers<[1], [0], [0], [1], [0, 0, 1, 1], [], []>} : vector<8x16xf32>, vector<16x128xf32>, vector<8x128xf32> -> vector<8x128xf32>
    %c0_3 = arith.constant 0 : index
    %c0_4 = arith.constant 0 : index
    %8 = vector.load %arg3[%c0_3, %c0_4] : memref<8x128xf32, #tpu.memory_space<vmem>>, vector<8x128xf32>
    tpu.vector_store %arg3[%c0_3, %c0_4], %7 {strides = array<i32>} : memref<8x128xf32, #tpu.memory_space<vmem>>, vector<8x128xf32>,
    return
  }
  func.func @transform_0(%arg0: i32) -> (i32, i32) {
    %c0_i32 = arith.constant 0 : i32
    %c0_i32_0 = arith.constant 0 : i32
    %c0_i32_1 = arith.constant 0 : i32
    return %c0_i32, %c0_i32_0 : i32, i32
  }
  func.func @transform_1(%arg0: i32) -> (i32, i32) {
    %c0_i32 = arith.constant 0 : i32
    %c0_i32_0 = arith.constant 0 : i32
    %c0_i32_1 = arith.constant 0 : i32
    return %c0_i32, %c0_i32_0 : i32, i32
  }
  func.func @transform_2(%arg0: i32) -> (i32, i32) {
    %c0_i32 = arith.constant 0 : i32
    %c0_i32_0 = arith.constant 0 : i32
    %c0_i32_1 = arith.constant 0 : i32
    return %c0_i32, %c0_i32_0 : i32, i32
  }
}

</mosaic_0001>

<bundles_post_ra>
// kernel: tpu_custom_call.1
= control target key start
LH: loop header
LB: loop body
LE: loop exit
PB: predicated region body
PF: predicated region fallthrough
CT: control target
= control target key end

     0   :  { %7 = vsyncpa [#allocation3], 0  ;;  %s249_s0 = inlined_call_operand.vmem [shape: s32[8,1], index: 0, kind: input, shape index: {}]   ;;  %s250_s1 = inlined_call_operand.hbm [shape: f32[16,128], index: 1, kind: input, shape index: {}]   ;;  %s251_s2 = inlined_call_operand.hbm [shape: f32[8,128], index: 2, kind: output, shape index: {}]  }
   0x1   :  { %8 = vsyncpa [#allocation4], 0  ;;  %s199_s9 = smov [#allocation2]   ;;  %s151_s13 = scalar_lea.hbm %s250_s1, 256 }
   0x2   :  { %s16_s10 = sshll.u32 %s199_s9, 4  ;;  %p152_p0 = scmp.ne.s32.totalorder %s250_s1, %s151_s13  ;;  %s17_s10 = int_to_ptr.vmem [resolvable:$true] %s16_s10 }
   0x3   :  { %p155_p1 = scmp.lt.u32.totalorder %s151_s13, %s250_s1 }
   0x5   :  { %p157_p2 = pnand %p155_p1, %p152_p0 }
   0x7   :  { %160 = shalt.err (!%p157_p2)
}
   0x8   :  { %s161_s18 = scalar_lea.vmem %s17_s10, 256  ;;  %p166_p4 = scmp.lt.s32.totalorder %s17_s10, %s17_s10 }
   0x9   :  { %p162_p3 = scmp.ne.s32.totalorder %s17_s10, %s161_s18  ;;  %p167_p5 = scmp.lt.s32.totalorder %s161_s18, %s161_s18 }
   0xb   :  { %p168_p6 = por %p167_p5, %p166_p4 }
   0xd   :  { %p169_p7 = pnand %p168_p6, %p162_p3 }
   0xf   :  { %172 = shalt.err (!%p169_p7)
}
  0x10   :  { %s200_s19 = smov 128   ;;  %s201_s20 = smov 8  }
  0x11   :  { %22 = dma.hbm_to_vmem [thread:$0]  %s250_s1, 256, %s17_s10, [#allocation3], %s200_s19, %s200_s19, %s201_s20  }
  0x12   :  { %195 = dma.done.wait [#allocation3], 256  }
  0x13   :  { %196 = vsyncadd [#allocation3], 4294967040  ;;  %v202_v0 = vmov 0   ;;  %v203_v1 = vmov 0.0|0.0   ;;  %v26_v2 = vld [vmem:[%s249_s0] sm:$0xff]  ;;  %v36_v4 = vld [vmem:[#allocation2 + $0x8] sm:$0xff]  ;;  %v27_v7 = vlaneseq }
  0x14   :  { %150 = vset.pattern.permute.xlu0 %v202_v0  ;;  %139 = vmatprep.subr.bf16.mxu0 %v203_v1  ;;  %v35_v3 = vld [vmem:[#allocation2] sm:$0xff]  ;;  %vm204_vm0 = vmmov 0   ;;  %v205_v6 = vmov 0.0   ;;  %vm37_vm1 = vcmask 130048   ;;  %s206_s1 = smov [#allocation5]  }
  0x15   :  { %30 = vperm.xlu0 %150, %v26_v2   ;;  %v140_v5 = vpack.c.bf16 %v36_v4, %v35_v3  ;;  %136 = vmatprep.mubr.msk.f32.mxu0 %vm204_vm0, %v205_v6  ;;  %v28_v8 = vand.u32 127, %v27_v7  ;;  %s118_s25 = sshll.u32 %s206_s1, 4  ;;  %s119_s25 = int_to_ptr.vmem [resolvable:$true] %s118_s25 }
  0x16   :  { %s173_s0 = scalar_lea.vmem %s119_s25, 128  ;;  %p178_p9 = scmp.lt.s32.totalorder %s119_s25, %s119_s25 }
  0x17   :  { %141 = vmatpush3.bf16.msra.mxu0 %v140_v5  ;;  %p174_p8 = scmp.ne.s32.totalorder %s119_s25, %s173_s0  ;;  %p179_p10 = scmp.lt.s32.totalorder %s173_s0, %s173_s0 }
  0x19   :  { %p180_p11 = por %p179_p10, %p178_p9 }
  0x1b   :  { %p181_p12 = pnand %p180_p11, %p174_p8 }
  0x94   :  { %v31_v9 = vpop.permute.xlu0 %30 }
  0x95   :  { %vm32_vm2 = vcmp.eq.s32.totalorder %v28_v8, %v31_v9 }
  0x96   :  { %v127_v10 = vsel %vm32_vm2, 1.0, %v205_v6 }
  0x97   :  { %137 = vmatmul.mubr.msk.f32.vlgmr.msra.gmra.mrb[0].mxu0 %vm37_vm1, %v127_v10 }
 0x16a   :  { %v107_v11 = vpop.f32.mrb[0].mxu0 }
 0x16b   :  { %111 = vst [vmem:[#allocation5] sm:$0xff] %v107_v11  ;;  %v138_v12 = vpop.f32.mrb[1].mxu0 }
 0x16c   :  { %184 = shalt.err (!%p181_p12)
}
 0x16d   :  { %s185_s28 = scalar_lea.hbm %s251_s2, 128 }
 0x16e   :  { %p186_p13 = scmp.ne.s32.totalorder %s251_s2, %s185_s28  ;;  %p189_p0 = scmp.lt.u32.totalorder %s185_s28, %s251_s2 }
 0x170   :  { %p191_p1 = pnand %p189_p0, %p186_p13 }
 0x172   :  { %194 = shalt.err (!%p191_p1)
}
 0x173   :  { %121 = dma.vmem_to_hbm [thread:$0]  %s119_s25, 128, %s251_s2, [#allocation4]  }
 0x174   :  { %197 = dma.done.wait [#allocation4], 128  }
 0x175   :  { %198 = vsyncadd [#allocation4], 4294967168 }
 0x176   :  { %125 = vsyncpa [#allocation3], 1 }
 0x177   :  { %126 = vsyncpa [#allocation4], 1 }

</bundles_post_ra>
